<compile_context>
chip_gen: v7x
topology: tpu7x:2x2x1
jax: 0.10.0
libtpu: 0.0.40
codegen_flags: <defaults>
</compile_context>

<pallas_src>
from functools import partial

import jax
import jax.numpy as jnp
from jax import lax
from jax.experimental import pallas as pl
from jax.experimental.pallas import tpu as pltpu


def _gaussian_membership_kernel(x_ref, t_ref, bias_ref, out_ref):
    # x_ref:    (tb, D)      batch tile
    # t_ref:    (D, R*D)     scaled block-diagonal replication matrix (resident)
    # bias_ref: (1, R*D)     -mean*inv_std, flattened (resident)
    # out_ref:  (tb, R*D)    lane-dense output tile
    x = x_ref[...].astype(jnp.float32)
    # MXU does the lane replication + inv_std scaling in one shot.
    z = jnp.dot(
        x,
        t_ref[...],
        preferred_element_type=jnp.float32,
        precision=lax.Precision.HIGHEST,
    ) + bias_ref[...]
    out_ref[...] = jnp.exp(-0.5 * (z * z)).astype(out_ref.dtype)


def gaussian_membership(x, mean, std, *, tb=None, out_dtype=jnp.float32,
                        vmem_budget_bytes=40 << 20):
    """x: (B, D); mean/std: (R, D). Returns (B, R, D) in `out_dtype`."""
    B, D = x.shape
    R, D2 = mean.shape
    assert D == D2
    RD = R * D

    # --- tiny (R, D) preprocessing in the wrapper: kills the per-element divide
    #     and builds the MXU replication matrix + bias. -------------------------
    inv_std = 1.0 / (std.astype(jnp.float32) + 1e-6)                 # (R, D)
    eye = jnp.eye(D, dtype=jnp.float32)                              # (D, D)
    # blocks[r, d, d'] = eye[d, d'] * inv_std[r, d]  (diag per rule)
    blocks = eye[None, :, :] * inv_std[:, :, None]                   # (R, D, D)
    t_mat = blocks.transpose(1, 0, 2).reshape(D, RD)                 # (D, R*D)
    bias = (-(mean.astype(jnp.float32) * inv_std)).reshape(1, RD)    # (1, R*D)

    out_itemsize = jnp.dtype(out_dtype).itemsize

    # --- batch-tile sizing (HBM-write-bound: go as big as VMEM allows). -------
    if tb is None:
        per_row_bytes = 2 * D * 4 + 2 * RD * out_itemsize      # dbl-buf x + out
        resident_bytes = 2 * (D * RD + RD) * 4                 # T + bias
        tb_cap = max(8, (vmem_budget_bytes - resident_bytes) // per_row_bytes)
        tb = min(B, 2048, int(tb_cap))
    if tb >= B:
        if B >= 16:
            # >= 2 grid steps so the "parallel" axis can shard across v7x's 2 TCs.
            tb = ((pl.cdiv(B, 2) + 7) // 8) * 8
        else:
            tb = B                      # full-extent block: always legal
    else:
        tb = max(8, (tb // 8) * 8)      # keep second-to-last block dim % 8 == 0

    grid = (pl.cdiv(B, tb),)

    out_flat = pl.pallas_call(
        _gaussian_membership_kernel,
        out_shape=jax.ShapeDtypeStruct((B, RD), out_dtype),
        grid_spec=pltpu.PrefetchScalarGridSpec(
            num_scalar_prefetch=0,
            grid=grid,
            in_specs=[
                pl.BlockSpec((tb, D), lambda i: (i, 0)),     # x tile
                pl.BlockSpec((D, RD), lambda i: (0, 0)),     # T (resident)
                pl.BlockSpec((1, RD), lambda i: (0, 0)),     # bias (resident)
            ],
            out_specs=pl.BlockSpec((tb, RD), lambda i: (i, 0)),
        ),
        compiler_params=pltpu.CompilerParams(
            dimension_semantics=("parallel",),
            vmem_limit_bytes=48 << 20,
        ),
    )(x, t_mat, bias)

    # (B, R*D) -> (B, R, D): contiguous reshape outside the kernel, free.
    return out_flat.reshape(B, R, D)


def gaussian_membership_ref(x, mean, std):
    z = (x[:, None, :] - mean[None, :, :]) / (std[None, :, :] + 1e-6)
    return jnp.exp(-0.5 * z * z)


if __name__ == "__main__":
    # Small shapes consistent with the module's forward.
    batch, input_dim, num_rules = 8, 32, 16

    key = jax.random.PRNGKey(0)
    kx, km = jax.random.split(key)

    x = jax.random.normal(kx, (batch, input_dim), dtype=jnp.float32)
    # Deterministic parameter init (matches __init__ shapes):
    mean = jax.random.normal(km, (num_rules, input_dim), dtype=jnp.float32)
    std = jnp.ones((num_rules, input_dim), dtype=jnp.float32)

    out = gaussian_membership(x, mean, std)
    out = jax.block_until_ready(out)

    ref = gaussian_membership_ref(x, mean, std)
    assert out.shape == (batch, num_rules, input_dim)
    assert jnp.allclose(out, ref, atol=1e-5, rtol=1e-5)

    print("KERNEL_OK")
</pallas_src>

<mosaic_0001>
module attributes {stable_mosaic.version = 11 : i64} {
  func.func @_gaussian_membership_kernel(%arg0: i32, %arg1: memref<8x32xf32, #tpu.memory_space<vmem>>, %arg2: memref<32x512xf32, #tpu.memory_space<vmem>>, %arg3: memref<1x512xf32, #tpu.memory_space<vmem>>, %arg4: memref<8x512xf32, #tpu.memory_space<vmem>>) attributes {dimension_semantics = [#tpu.dimension_semantics<parallel>], iteration_bounds = array<i64: 1>, scalar_prefetch = 0 : i64, scratch_operands = 0 : i64, tpu.core_type = #tpu.core_type<tc>, window_params = [{transform_indices = @transform_0, window_bounds = array<i64: 8, 32>}, {pipeline_mode = #tpu.pipeline_mode<synchronous>, transform_indices = @transform_1, window_bounds = array<i64: 32, 512>}, {pipeline_mode = #tpu.pipeline_mode<synchronous>, transform_indices = @transform_2, window_bounds = array<i64: 1, 512>}, {transform_indices = @transform_3, window_bounds = array<i64: 8, 512>}]} {
    %c0 = arith.constant 0 : index
    %c0_0 = arith.constant 0 : index
    %0 = vector.load %arg1[%c0, %c0_0] : memref<8x32xf32, #tpu.memory_space<vmem>>, vector<8x32xf32>
    %c0_1 = arith.constant 0 : index
    %c0_2 = arith.constant 0 : index
    %1 = vector.load %arg2[%c0_1, %c0_2] : memref<32x512xf32, #tpu.memory_space<vmem>>, vector<32x512xf32>
    %cst = arith.constant dense<0.000000e+00> : vector<8x512xf32>
    %2 = tpu.matmul %0, %1, %cst {dimension_numbers = #tpu.dot_dimension_numbers<[1], [0], [0], [1], [0, 0, 1, 1], [], []>, precision = #tpu.contract_precision<fp32>} : vector<8x32xf32>, vector<32x512xf32>, vector<8x512xf32> -> vector<8x512xf32>
    %c0_3 = arith.constant 0 : index
    %c0_4 = arith.constant 0 : index
    %3 = vector.load %arg3[%c0_3, %c0_4] : memref<1x512xf32, #tpu.memory_space<vmem>>, vector<1x512xf32>
    %4 = vector.broadcast %3 : vector<1x512xf32> to vector<8x512xf32>
    %5 = arith.addf %2, %4 : vector<8x512xf32>
    %6 = arith.mulf %5, %5 : vector<8x512xf32>
    %cst_5 = arith.constant -5.000000e-01 : f32
    %7 = vector.broadcast %cst_5 : f32 to vector<8x512xf32>
    %8 = arith.mulf %7, %6 : vector<8x512xf32>
    %9 = math.exp %8 : vector<8x512xf32>
    %c0_6 = arith.constant 0 : index
    %c0_7 = arith.constant 0 : index
    %10 = vector.load %arg4[%c0_6, %c0_7] : memref<8x512xf32, #tpu.memory_space<vmem>>, vector<8x512xf32>
    tpu.vector_store %arg4[%c0_6, %c0_7], %9 {strides = array<i32>} : memref<8x512xf32, #tpu.memory_space<vmem>>, vector<8x512xf32>,
    return
  }
  func.func @transform_0(%arg0: i32) -> (i32, i32) {
    %c0_i32 = arith.constant 0 : i32
    %c0_i32_0 = arith.constant 0 : i32
    return %arg0, %c0_i32 : i32, i32
  }
  func.func @transform_1(%arg0: i32) -> (i32, i32) {
    %c0_i32 = arith.constant 0 : i32
    %c0_i32_0 = arith.constant 0 : i32
    %c0_i32_1 = arith.constant 0 : i32
    return %c0_i32, %c0_i32_0 : i32, i32
  }
  func.func @transform_2(%arg0: i32) -> (i32, i32) {
    %c0_i32 = arith.constant 0 : i32
    %c0_i32_0 = arith.constant 0 : i32
    %c0_i32_1 = arith.constant 0 : i32
    return %c0_i32, %c0_i32_0 : i32, i32
  }
  func.func @transform_3(%arg0: i32) -> (i32, i32) {
    %c0_i32 = arith.constant 0 : i32
    %c0_i32_0 = arith.constant 0 : i32
    return %arg0, %c0_i32 : i32, i32
  }
}

</mosaic_0001>

<bundles_post_ra>
// kernel: tpu_custom_call.1
= control target key start
LH: loop header
LB: loop body
LE: loop exit
PB: predicated region body
PF: predicated region fallthrough
CT: control target
= control target key end

     0   :  { %8 = vsyncpa [#allocation3], 0  ;;  %s1697_s0 = inlined_call_operand.hbm [shape: f32[8,32], index: 0, kind: input, shape index: {}]   ;;  %s1698_s1 = inlined_call_operand.hbm [shape: f32[32,512], index: 1, kind: input, shape index: {}]   ;;  %s1699_s2 = inlined_call_operand.vmem [shape: f32[1,512], index: 2, kind: input, shape index: {}]   ;;  %s1700_s3 = inlined_call_operand.hbm [shape: f32[8,512], index: 3, kind: output, shape index: {}]  }
   0x1   :  { %9 = vsyncpa [#allocation6], 0 }
   0x2   :  { %10 = vsyncpa [#allocation4], 0  ;;  %s1412_s12 = smov [#allocation2]   ;;  %s1413_s14 = smov [#allocation5]  }
   0x3   :  { %s17_s13 = sshll.u32 %s1412_s12, 4  ;;  %s26_s15 = sshll.u32 %s1413_s14, 4  ;;  %s18_s13 = int_to_ptr.vmem [resolvable:$true] %s17_s13  ;;  %s1438_s15 = int_to_ptr.vmem [resolvable:$true] %s26_s15 }
   0x4   :  { %s1340_s18 = scalar_lea.hbm %s1697_s0, 128 }
   0x5   :  { %p1341_p0 = scmp.ne.s32.totalorder %s1697_s0, %s1340_s18  ;;  %p1344_p1 = scmp.lt.u32.totalorder %s1340_s18, %s1697_s0 }
   0x7   :  { %p1346_p2 = pnand %p1344_p1, %p1341_p0 }
   0x9   :  { %1349 = shalt.err (!%p1346_p2)
}
   0xa   :  { %s1350_s23 = scalar_lea.vmem %s18_s13, 128  ;;  %p1355_p4 = scmp.lt.s32.totalorder %s18_s13, %s18_s13 }
   0xb   :  { %p1351_p3 = scmp.ne.s32.totalorder %s18_s13, %s1350_s23  ;;  %p1356_p5 = scmp.lt.s32.totalorder %s1350_s23, %s1350_s23 }
   0xd   :  { %p1357_p6 = por %p1356_p5, %p1355_p4 }
   0xf   :  { %p1358_p7 = pnand %p1357_p6, %p1351_p3 }
  0x11   :  { %1361 = shalt.err (!%p1358_p7)
}
  0x12   :  { %20 = dma.hbm_to_vmem [thread:$0]  %s1697_s0, 128, %s18_s13, [#allocation3]  }
  0x13   :  { %s1362_s28 = scalar_lea.hbm %s1698_s1, 2048 }
  0x14   :  { %p1363_p8 = scmp.ne.s32.totalorder %s1698_s1, %s1362_s28  ;;  %p1366_p9 = scmp.lt.u32.totalorder %s1362_s28, %s1698_s1 }
  0x16   :  { %p1368_p10 = pnand %p1366_p9, %p1363_p8 }
  0x18   :  { %1371 = shalt.err (!%p1368_p10)
}
  0x19   :  { %s1372_s6 = scalar_lea.vmem %s1438_s15, 2048  ;;  %p1377_p12 = scmp.lt.s32.totalorder %s1438_s15, %s1438_s15 }
  0x1a   :  { %p1373_p11 = scmp.ne.s32.totalorder %s1438_s15, %s1372_s6  ;;  %p1378_p13 = scmp.lt.s32.totalorder %s1372_s6, %s1372_s6 }
  0x1c   :  { %p1379_p0 = por %p1378_p13, %p1377_p12 }
  0x1e   :  { %p1380_p1 = pnand %p1379_p0, %p1373_p11 }
  0x20   :  { %1383 = shalt.err (!%p1380_p1)
}
  0x21   :  { %s1414_s0 = smov 512   ;;  %s1415_s7 = smov 32  }
  0x22   :  { %32 = dma.hbm_to_vmem [thread:$0]  %s1698_s1, 2048, %s1438_s15, [#allocation6], %s1414_s0, %s1414_s0, %s1415_s7  }
  0x23   :  { %1406 = dma.done.wait [#allocation3], 128  }
  0x24   :  { %1407 = vsyncadd [#allocation3], 4294967168 }
  0x25   :  { %1408 = dma.done.wait [#allocation6], 2048  }
  0x26   :  { %1409 = vsyncadd [#allocation6], 4294965248  ;;  %v1416_v0 = vmov 0.0   ;;  %v43_v1 = vld [vmem:[#allocation5 + $0x8] sm:$0xff]  ;;  %v45_v3 = vld [vmem:[#allocation5 + $0x18] sm:$0xff]  ;;  %vm80_vm0 = vcmask 261120  }
  0x27   :  { %156 = vmatprep.mubr.f32.mxu0 %v1416_v0  ;;  %699 = vmatprep.mubr.f32.mxu1 %v1416_v0  ;;  %v47_v2 = vld [vmem:[#allocation5 + $0x28] sm:$0xff]  ;;  %v84_v4 = vand.u32 4294901760, %v43_v1  ;;  %v49_v6 = vld [vmem:[#allocation5 + $0x38] sm:$0xff]  ;;  %v627_v7 = vand.u32 4294901760, %v45_v3  ;;  %v42_v8 = vld [vmem:[#allocation5] sm:$0xff] }
  0x28   :  { %v88_v5 = vand.u32 4294901760, %v47_v2  ;;  %v46_v9 = vld [vmem:[#allocation5 + $0x20] sm:$0xff]  ;;  %v631_v10 = vand.u32 4294901760, %v49_v6  ;;  %v86_v11 = vand.u32 4294901760, %v42_v8  ;;  %v44_v13 = vld [vmem:[#allocation5 + $0x10] sm:$0xff]  ;;  %v51_v15 = vld [vmem:[#allocation5 + $0x48] sm:$0xff] }
  0x29   :  { %v90_v12 = vand.u32 4294901760, %v46_v9  ;;  %v48_v14 = vld [vmem:[#allocation5 + $0x30] sm:$0xff]  ;;  %v1473_v17 = vsub.f32 %v43_v1, %v84_v4  ;;  %v1477_v19 = vsub.f32 %v45_v3, %v627_v7  ;;  %v55_v20 = vld [vmem:[#allocation5 + $0x68] sm:$0xff]  ;;  %v53_v21 = vld [vmem:[#allocation5 + $0x58] sm:$0xff]  ;;  %v629_v29 = vand.u32 4294901760, %v44_v13 }
  0x2a   :  { %v1471_v16 = vpack.c.bf16 %v88_v5, %v84_v4  ;;  %v1475_v18 = vsub.f32 %v47_v2, %v88_v5  ;;  %v57_v22 = vld [vmem:[#allocation5 + $0x78] sm:$0xff]  ;;  %v1479_v23 = vpack.c.bf16 %v631_v10, %v627_v7  ;;  %v1481_v24 = vsub.f32 %v49_v6, %v631_v10  ;;  %v50_v27 = vld [vmem:[#allocation5 + $0x40] sm:$0xff]  ;;  %v52_v37 = vld [vmem:[#allocation5 + $0x50] sm:$0xff] }
  0x2b   :  { %v1483_v25 = vpack.c.bf16 %v90_v12, %v86_v11  ;;  %v1485_v26 = vsub.f32 %v42_v8, %v86_v11  ;;  %v1488_v28 = vsub.f32 %v46_v9, %v90_v12  ;;  %v633_v30 = vand.u32 4294901760, %v48_v14  ;;  %v54_v35 = vld [vmem:[#allocation5 + $0x60] sm:$0xff]  ;;  %v56_v42 = vld [vmem:[#allocation5 + $0x70] sm:$0xff]  ;;  %v41_v43 = vld [vmem:[#allocation2] sm:$0xff] }
  0x2c   :  { %1207 = vmatprep.subr.bf16.mxu0 %v1471_v16  ;;  %v92_v31 = vand.u32 4294901760, %v51_v15  ;;  %1255 = vmatprep.subr.bf16.mxu1 %v1479_v23  ;;  %v96_v32 = vand.u32 4294901760, %v55_v20  ;;  %v635_v33 = vand.u32 4294901760, %v53_v21  ;;  %v639_v34 = vand.u32 4294901760, %v57_v22 }
  0x2d   :  { %1209 = vmatpush1.bf16.msra.mxu0 %v1483_v25  ;;  %v94_v36 = vand.u32 4294901760, %v50_v27  ;;  %v1492_v38 = vpack.c.bf16 %v633_v30, %v629_v29  ;;  %v1494_v39 = vsub.f32 %v44_v13, %v629_v29  ;;  %v1496_v40 = vsub.f32 %v48_v14, %v633_v30 }
  0x2e   :  { %v1498_v41 = vsub.f32 %v51_v15, %v92_v31  ;;  %v1500_v44 = vpack.c.bf16 %v96_v32, %v92_v31  ;;  %v1502_v45 = vsub.f32 %v55_v20, %v96_v32  ;;  %v1504_v46 = vpack.c.bf16 %v639_v34, %v635_v33 }
  0x2f   :  { %v1506_v47 = vsub.f32 %v53_v21, %v635_v33  ;;  %1257 = vmatpush1.bf16.msra.mxu1 %v1492_v38  ;;  %v1509_v48 = vsub.f32 %v57_v22, %v639_v34  ;;  %v98_v49 = vand.u32 4294901760, %v54_v35  ;;  %v1511_v50 = vsub.f32 %v50_v27, %v94_v36 }
  0x30   :  { %v637_v51 = vand.u32 4294901760, %v52_v37  ;;  %1211 = vmatprep.subr.bf16.mxu0 %v1500_v44  ;;  %1259 = vmatprep.subr.bf16.mxu1 %v1504_v46  ;;  %v641_v52 = vand.u32 4294901760, %v56_v42  ;;  %v82_v53 = vsel %vm80_vm0, %v41_v43, 0  ;;  %v170_v54 = vand.u32 4294901760, %v1473_v17 }
  0x31   :  { %v182_v55 = vand.u32 4294901760, %v1475_v18  ;;  %v1518_v56 = vpack.c.bf16 %v98_v49, %v94_v36  ;;  %v1520_v57 = vsub.f32 %v54_v35, %v98_v49  ;;  %v1524_v59 = vand.u32 4294901760, %v82_v53 }
  0x32   :  { %v1522_v58 = vsub.f32 %v52_v37, %v637_v51  ;;  %v1526_v60 = vpack.c.bf16 %v641_v52, %v637_v51  ;;  %v1528_v61 = vsub.f32 %v56_v42, %v641_v52  ;;  %v171_v62 = vsub.f32 %v1473_v17, %v170_v54 }
  0x33   :  { %v183_v63 = vsub.f32 %v1475_v18, %v182_v55  ;;  %1213 = vmatpush1.bf16.msra.mxu0 %v1518_v56  ;;  %v1538_v1 = vsub.f32 %v82_v53, %v1524_v59  ;;  %v713_v2 = vand.u32 4294901760, %v1477_v19  ;;  %v725_v3 = vand.u32 4294901760, %v1481_v24 }
  0x34   :  { %v176_v4 = vand.u32 4294901760, %v1485_v26  ;;  %1261 = vmatpush1.bf16.msra.mxu1 %v1526_v60  ;;  %v172_v5 = vand.u32 4294901760, %v171_v62  ;;  %v188_v7 = vand.u32 4294901760, %v1488_v28  ;;  %v719_v8 = vand.u32 4294901760, %v1494_v39 }
  0x35   :  { %v184_v6 = vand.u32 4294901760, %v183_v63  ;;  %v1547_v9 = vand.u32 4294901760, %v1538_v1  ;;  %v714_v10 = vsub.f32 %v1477_v19, %v713_v2  ;;  %v726_v11 = vsub.f32 %v1481_v24, %v725_v3 }
  0x36   :  { %v177_v12 = vsub.f32 %v1485_v26, %v176_v4  ;;  %v189_v14 = vsub.f32 %v1488_v28, %v188_v7  ;;  %v720_v15 = vsub.f32 %v1494_v39, %v719_v8  ;;  %v731_v20 = vand.u32 4294901760, %v1496_v40 }
  0x37   :  { %v1214_v13 = vpack.c.bf16 %v184_v6, %v172_v5  ;;  %v160_v21 = vsub.f32 %v1538_v1, %v1547_v9  ;;  %v715_v22 = vand.u32 4294901760, %v714_v10  ;;  %v727_v27 = vand.u32 4294901760, %v726_v11 }
  0x38   :  { %v178_v29 = vand.u32 4294901760, %v177_v12  ;;  %v190_v30 = vand.u32 4294901760, %v189_v14  ;;  %v721_v31 = vand.u32 4294901760, %v720_v15  ;;  %v732_v32 = vsub.f32 %v1496_v40, %v731_v20 }
  0x39   :  { %1215 = vmatprep.subr.bf16.mxu0 %v1214_v13  ;;  %v194_v33 = vand.u32 4294901760, %v1498_v41  ;;  %v161_v34 = vand.u32 4294901760, %v160_v21  ;;  %v1262_v35 = vpack.c.bf16 %v727_v27, %v715_v22  ;;  %v206_v36 = vand.u32 4294901760, %v1502_v45 }
  0x3a   :  { %v737_v37 = vand.u32 4294901760, %v1506_v47  ;;  %v1216_v42 = vpack.c.bf16 %v190_v30, %v178_v29  ;;  %v733_v43 = vand.u32 4294901760, %v732_v32  ;;  %v749_v51 = vand.u32 4294901760, %v1509_v48 }
  0x3b   :  { %v195_v49 = vsub.f32 %v1498_v41, %v194_v33  ;;  %162 = vmatmul.mubr.f32.vlgmr.msra.gmra.mrb[0].mxu0 %v161_v34  ;;  %705 = vmatmul.mubr.f32.vlgmr.msra.gmra.mrb[0].mxu1 %v161_v34  ;;  %v207_v52 = vsub.f32 %v1502_v45, %v206_v36  ;;  %v200_v62 = vand.u32 4294901760, %v1511_v50  ;;  %v212_v63 = vand.u32 4294901760, %v1520_v57 }
  0x3c   :  { %v738_v53 = vsub.f32 %v1506_v47, %v737_v37  ;;  %1263 = vmatprep.subr.bf16.mxu1 %v1262_v35  ;;  %1217 = vmatpush1.bf16.msra.mxu0 %v1216_v42  ;;  %v1264_v5 = vpack.c.bf16 %v733_v43, %v721_v31  ;;  %v750_v10 = vsub.f32 %v1509_v48, %v749_v51  ;;  %v743_v11 = vand.u32 4294901760, %v1522_v58 }
  0x3d   :  { %v196_v6 = vand.u32 4294901760, %v195_v49  ;;  %v208_v12 = vand.u32 4294901760, %v207_v52  ;;  %v201_v14 = vsub.f32 %v1511_v50, %v200_v62  ;;  %v213_v15 = vsub.f32 %v1520_v57, %v212_v63  ;;  %272 = vmatprep.mubr.f32.mxu0 %v1416_v0  ;;  %815 = vmatprep.mubr.f32.mxu1 %v1416_v0 }
  0x3e   :  { %v739_v13 = vand.u32 4294901760, %v738_v53  ;;  %1265 = vmatpush1.bf16.msra.mxu1 %v1264_v5  ;;  %v751_v21 = vand.u32 4294901760, %v750_v10  ;;  %v744_v22 = vsub.f32 %v1522_v58, %v743_v11  ;;  %v755_v27 = vand.u32 4294901760, %v1528_v61 }
  0x3f   :  { %v1218_v29 = vpack.c.bf16 %v208_v12, %v196_v6  ;;  %v202_v30 = vand.u32 4294901760, %v201_v14  ;;  %v214_v31 = vand.u32 4294901760, %v213_v15  ;;  %v1222_v42 = vpack.c.bf16 %v1475_v18, %v1473_v17 }
  0x40   :  { %v1266_v32 = vpack.c.bf16 %v751_v21, %v739_v13  ;;  %v745_v34 = vand.u32 4294901760, %v744_v22  ;;  %v756_v35 = vsub.f32 %v1528_v61, %v755_v27  ;;  %v1270_v52 = vpack.c.bf16 %v1481_v24, %v1477_v19 }
  0x41   :  { %1219 = vmatprep.subr.bf16.mxu0 %v1218_v29  ;;  %v1220_v43 = vpack.c.bf16 %v214_v31, %v202_v30  ;;  %v1224_v53 = vpack.c.bf16 %v1488_v28, %v1485_v26  ;;  %v1226_v6 = vpack.c.bf16 %v1502_v45, %v1498_v41  ;;  %v1272_v10 = vpack.c.bf16 %v1496_v40, %v1494_v39  ;;  %v58_v39 = vld [vmem:[%s1699_s2] sm:$0xf]  ;;  %s1417_s2 = smov [#allocation7]  }
  0x42   :  { %1267 = vmatprep.subr.bf16.mxu1 %v1266_v32  ;;  %v757_v49 = vand.u32 4294901760, %v756_v35  ;;  %v1274_v12 = vpack.c.bf16 %v1509_v48, %v1506_v47  ;;  %v1228_v13 = vpack.c.bf16 %v1520_v57, %v1511_v50  ;;  %v1276_v14 = vpack.c.bf16 %v1528_v61, %v1522_v58  ;;  %s1196_s11 = sshll.u32 %s1417_s2, 4  ;;  %s1197_s11 = int_to_ptr.vmem [resolvable:$true] %s1196_s11 }
  0x43   :  { %1221 = vmatpush1.bf16.msra.mxu0 %v1220_v43  ;;  %v1238_v61 = vpack.c.bf16 %v182_v55, %v170_v54  ;;  %v1286_v15 = vpack.c.bf16 %v725_v3, %v713_v2  ;;  %v1240_v17 = vpack.c.bf16 %v188_v7, %v176_v4  ;;  %v1242_v18 = vpack.c.bf16 %v206_v36, %v194_v33  ;;  %s1384_s12 = scalar_lea.vmem %s1197_s11, 512  ;;  %p1389_p3 = scmp.lt.s32.totalorder %s1197_s11, %s1197_s11 }
  0x44   :  { %v1268_v5 = vpack.c.bf16 %v757_v49, %v745_v34  ;;  %1223 = vmatprep.subr.bf16.mxu0 %v1222_v42  ;;  %v1288_v19 = vpack.c.bf16 %v731_v20, %v719_v8  ;;  %v1290_v24 = vpack.c.bf16 %v749_v51, %v737_v37  ;;  %v1244_v26 = vpack.c.bf16 %v212_v63, %v200_v62  ;;  %p1385_p2 = scmp.ne.s32.totalorder %s1197_s11, %s1384_s12  ;;  %p1390_p4 = scmp.lt.s32.totalorder %s1384_s12, %s1384_s12 }
  0x45   :  { %v1292_v28 = vpack.c.bf16 %v755_v27, %v743_v11 }
  0x46   :  { %1269 = vmatpush1.bf16.msra.mxu1 %v1268_v5  ;;  %274 = vmatmul.mubr.f32.vlgmr.msra.gmra.mrb[0].mxu0 %v1524_v59  ;;  %p1391_p5 = por %p1390_p4, %p1389_p3 }
  0x47   :  { %1271 = vmatprep.subr.bf16.mxu1 %v1270_v52  ;;  %1225 = vmatpush1.bf16.msra.mxu0 %v1224_v53 }
  0x48   :  { %1227 = vmatprep.subr.bf16.mxu0 %v1226_v6  ;;  %360 = vmatprep.mubr.f32.mxu0 %v1416_v0  ;;  %p1392_p6 = pnand %p1391_p5, %p1385_p2 }
  0x49   :  { %817 = vmatmul.mubr.f32.vlgmr.msra.gmra.mrb[0].mxu1 %v1524_v59 }
  0x4a   :  { %1273 = vmatpush1.bf16.msra.mxu1 %v1272_v10  ;;  %903 = vmatprep.mubr.f32.mxu1 %v1416_v0 }
  0x4b   :  { %1275 = vmatprep.subr.bf16.mxu1 %v1274_v12  ;;  %1229 = vmatpush1.bf16.msra.mxu0 %v1228_v13 }
  0x4c   :  { %1231 = vmatprep.subr.bf16.mxu0 %v1471_v16 }
  0x4e   :  { %1277 = vmatpush1.bf16.msra.mxu1 %v1276_v14  ;;  %363 = vmatmul.mubr.f32.vlgmr.msra.gmra.mrb[0].mxu0 %v1538_v1 }
  0x4f   :  { %1279 = vmatprep.subr.bf16.mxu1 %v1479_v23  ;;  %1233 = vmatpush1.bf16.msra.mxu0 %v1483_v25 }
  0x50   :  { %1235 = vmatprep.subr.bf16.mxu0 %v1500_v44  ;;  %441 = vmatprep.mubr.f32.mxu0 %v1416_v0 }
  0x51   :  { %906 = vmatmul.mubr.f32.vlgmr.msra.gmra.mrb[0].mxu1 %v1538_v1 }
  0x52   :  { %1281 = vmatpush1.bf16.msra.mxu1 %v1492_v38  ;;  %984 = vmatprep.mubr.f32.mxu1 %v1416_v0 }
  0x53   :  { %1283 = vmatprep.subr.bf16.mxu1 %v1504_v46  ;;  %1237 = vmatpush1.bf16.msra.mxu0 %v1518_v56 }
  0x54   :  { %1239 = vmatprep.subr.bf16.mxu0 %v1238_v61 }
  0x56   :  { %1285 = vmatpush1.bf16.msra.mxu1 %v1526_v60  ;;  %445 = vmatmul.mubr.f32.vlgmr.msra.gmra.mrb[0].mxu0 %v1547_v9 }
  0x57   :  { %1287 = vmatprep.subr.bf16.mxu1 %v1286_v15  ;;  %1241 = vmatpush1.bf16.msra.mxu0 %v1240_v17 }
  0x58   :  { %1243 = vmatprep.subr.bf16.mxu0 %v1242_v18  ;;  %539 = vmatprep.mubr.f32.mxu0 %v1416_v0 }
  0x59   :  { %988 = vmatmul.mubr.f32.vlgmr.msra.gmra.mrb[0].mxu1 %v1547_v9 }
  0x5a   :  { %1289 = vmatpush1.bf16.msra.mxu1 %v1288_v19  ;;  %1082 = vmatprep.mubr.f32.mxu1 %v1416_v0 }
  0x5b   :  { %1291 = vmatprep.subr.bf16.mxu1 %v1290_v24  ;;  %1245 = vmatpush1.bf16.msra.mxu0 %v1244_v26 }
  0x5c   :  { %1247 = vmatprep.subr.bf16.mxu0 %v1471_v16  ;;  %v60_v16 = vlaneseq }
  0x5e   :  { %1293 = vmatpush1.bf16.msra.mxu1 %v1292_v28  ;;  %541 = vmatmul.mubr.f32.vlgmr.msra.gmra.mrb[0].mxu0 %v1524_v59 }
  0x5f   :  { %1295 = vmatprep.subr.bf16.mxu1 %v1479_v23  ;;  %1249 = vmatpush1.bf16.msra.mxu0 %v1483_v25  ;;  %v61_v23 = vshrl.u32 %v60_v16, 7 }
  0x60   :  { %1251 = vmatprep.subr.bf16.mxu0 %v1500_v44  ;;  %619 = vmatprep.mubr.f32.mxu0 %v1416_v0 }
  0x61   :  { %1084 = vmatmul.mubr.f32.vlgmr.msra.gmra.mrb[0].mxu1 %v1524_v59  ;;  %v62_v25 = vsub.s32 0, %v61_v23  ;;  %v70_v40 = vsub.s32 2, %v61_v23  ;;  %v74_v41 = vsub.s32 3, %v61_v23 }
  0x62   :  { %1297 = vmatpush1.bf16.msra.mxu1 %v1492_v38  ;;  %1162 = vmatprep.mubr.f32.mxu1 %v1416_v0  ;;  %v66_v38 = vsub.s32 1, %v61_v23 }
  0x63   :  { %1299 = vmatprep.subr.bf16.mxu1 %v1504_v46  ;;  %1253 = vmatpush1.bf16.msra.mxu0 %v1518_v56  ;;  %v63_v0 = vrot.slane %v58_v39, %v62_v25  ;;  %v71_v46 = vrot.slane %v58_v39, %v70_v40  ;;  %v75_v50 = vrot.slane %v58_v39, %v74_v41 }
  0x64   :  { %v67_v44 = vrot.slane %v58_v39, %v66_v38 }
  0x66   :  { %1301 = vmatpush1.bf16.msra.mxu1 %v1526_v60  ;;  %621 = vmatmul.mubr.f32.vlgmr.msra.gmra.mrb[0].mxu0 %v1524_v59 }
  0x69   :  { %1164 = vmatmul.mubr.f32.vlgmr.msra.gmra.mrb[0].mxu1 %v1524_v59 }
 0x139   :  { %v622_v45 = vpop.f32.mrb[0].mxu0 }
 0x13a   :  { %v1302_v47 = vadd.f32 %v622_v45, %v63_v0  ;;  %v624_v48 = vpop.f32.mrb[1].mxu0 }
 0x13b   :  { %v1303_v54 = vadd.f32 %v624_v48, %v67_v44 }
 0x13c   :  { %v1170_v55 = vmul.f32 %v1302_v47, %v1302_v47  ;;  %v1165_v56 = vpop.f32.mrb[0].mxu1 }
 0x13d   :  { %v1304_v57 = vadd.f32 %v1165_v56, %v71_v46  ;;  %v1171_v58 = vmul.f32 %v1303_v54, %v1303_v54  ;;  %v1167_v59 = vpop.f32.mrb[1].mxu1 }
 0x13e   :  { %v1174_v60 = vmul.f32 -0.5, %v1170_v55  ;;  %v1305_v1 = vadd.f32 %v1167_v59, %v75_v50 }
 0x13f   :  { %v1172_v2 = vmul.f32 %v1304_v57, %v1304_v57  ;;  %v1175_v3 = vmul.f32 -0.5, %v1171_v58 }
 0x140   :  { %v1178_v4 = vmul.f32 1.442695, %v1174_v60  ;;  %v1173_v7 = vmul.f32 %v1305_v1, %v1305_v1 }
 0x141   :  { %v1176_v8 = vmul.f32 -0.5, %v1172_v2  ;;  %v1180_v9 = vmul.f32 1.442695, %v1175_v3 }
 0x142   :  { %1332 = vpow2.f32 %v1178_v4  ;;  %v1177_v20 = vmul.f32 -0.5, %v1173_v7 }
 0x143   :  { %v1182_v33 = vmul.f32 1.442695, %v1176_v8  ;;  %1334 = vpow2.f32 %v1180_v9 }
 0x144   :  { %v1184_v36 = vmul.f32 1.442695, %v1177_v20 }
 0x145   :  { %1336 = vpow2.f32 %v1182_v33 }
 0x146   :  { %1338 = vpow2.f32 %v1184_v36 }
 0x14c   :  { %v1333_v37 = vpop.eup %1332 }
 0x14d   :  { %v1335_v51 = vpop.eup %1334  ;;  %1186 = vst [vmem:[#allocation7] sm:$0xff] %v1333_v37 }
 0x14e   :  { %1187 = vst [vmem:[#allocation7 + $0x8] sm:$0xff] %v1335_v51 }
 0x14f   :  { %v1337_v62 = vpop.eup %1336 }
 0x150   :  { %v1339_v63 = vpop.eup %1338  ;;  %1188 = vst [vmem:[#allocation7 + $0x10] sm:$0xff] %v1337_v62 }
 0x151   :  { %1189 = vst [vmem:[#allocation7 + $0x18] sm:$0xff] %v1339_v63 }
 0x152   :  { %1395 = shalt.err (!%p1392_p6)
}
 0x153   :  { %s1396_s15 = scalar_lea.hbm %s1700_s3, 512 }
 0x154   :  { %p1397_p7 = scmp.ne.s32.totalorder %s1700_s3, %s1396_s15  ;;  %p1400_p8 = scmp.lt.u32.totalorder %s1396_s15, %s1700_s3 }
 0x156   :  { %p1402_p9 = pnand %p1400_p8, %p1397_p7 }
 0x158   :  { %1405 = shalt.err (!%p1402_p9)
}
 0x159   :  { %1199 = dma.vmem_to_hbm [thread:$0]  %s1197_s11, 512, %s1700_s3, [#allocation4]  }
 0x15a   :  { %1410 = dma.done.wait [#allocation4], 512  }
 0x15b   :  { %1411 = vsyncadd [#allocation4], 4294966784 }
 0x15c   :  { %1203 = vsyncpa [#allocation3], 1 }
 0x15d   :  { %1204 = vsyncpa [#allocation6], 1 }
 0x15e   :  { %1205 = vsyncpa [#allocation4], 1 }

</bundles_post_ra>
